<compile_context>
chip_gen: v5e
topology: v5e:2x2
jax: 0.10.0
libtpu: 0.0.40
codegen_flags: <defaults>
</compile_context>

<pallas_src>
import functools

import jax
import jax.numpy as jnp
from jax.experimental import pallas as pl
from jax.experimental.pallas import tpu as pltpu


EPS = 1e-5
NEG_SLOPE = 0.2
LANE = 128
SUBLANE_BF16 = 16


def _round_up(n, m):
    return ((n + m - 1) // m) * m


def _pad2(a, rows, cols):
    return jnp.pad(a, ((0, rows - a.shape[0]), (0, cols - a.shape[1])))


# -----------------------------------------------------------------------------
# Kernel
# -----------------------------------------------------------------------------
def _generator_kernel(x_ref,
                      w1_ref, v1_ref,
                      w2_ref, v2_ref,
                      w3_ref, v3_ref,
                      w4_ref, b4_ref,
                      out_ref, *, real_batch):
    """Whole generator MLP in one kernel (all tensors VMEM-resident).

    v*_ref are (3, N_pad) f32: rows = [bias, gamma, beta].
    """
    b_pad = x_ref.shape[0]
    inv_b = 1.0 / real_batch

    if real_batch < b_pad:
        # Mask out zero-padded batch rows: after the bias add they would be
        # h = bias (not 0) and contaminate the BatchNorm statistics.
        row_mask = (jax.lax.broadcasted_iota(jnp.int32, (b_pad, 1), 0)
                    < real_batch)
    else:
        row_mask = None

    def linear_lrelu_bn(x_bf16, w_ref, v_ref):
        v = v_ref[...]
        bias, gamma, beta = v[0:1, :], v[1:2, :], v[2:3, :]
        # Linear on MXU: bf16 operands, f32 accumulation; bias add in f32.
        h = jnp.dot(x_bf16, w_ref[...], preferred_element_type=jnp.float32)
        h = h + bias
        if row_mask is not None:
            h = jnp.where(row_mask, h, 0.0)
        # LeakyReLU(0.2): one mul + one max (0 stays 0 for padded rows).
        h = jnp.maximum(h, NEG_SLOPE * h)
        # BatchNorm1d (training mode, biased variance) with centered variance
        # to avoid E[h^2] - mean^2 cancellation.
        mean = jnp.sum(h, axis=0, keepdims=True) * inv_b
        d = h - mean
        if row_mask is not None:
            d = jnp.where(row_mask, d, 0.0)
        var = jnp.sum(d * d, axis=0, keepdims=True) * inv_b
        scale = gamma * jax.lax.rsqrt(var + EPS)
        # Next layer consumes bf16 on the MXU.
        return (d * scale + beta).astype(jnp.bfloat16)

    x = x_ref[...]                                    # bf16, lane/sublane padded
    h = linear_lrelu_bn(x, w1_ref, v1_ref)
    h = linear_lrelu_bn(h, w2_ref, v2_ref)
    h = linear_lrelu_bn(h, w3_ref, v3_ref)
    y = jnp.dot(h, w4_ref[...], preferred_element_type=jnp.float32) + b4_ref[...]
    out_ref[...] = jnp.tanh(y).astype(out_ref.dtype)


# -----------------------------------------------------------------------------
# Wrapper
# -----------------------------------------------------------------------------
def generator_forward(z, labels, padded_params, img_shape):
    """Embedding gather + concat (glue) in JAX, fused MLP hot path in Pallas."""
    p = padded_params
    emb = p["emb"][labels]                               # (B, embedding_dim)
    gen_input = jnp.concatenate([z, emb], axis=-1)       # (B, latent+emb)

    batch = gen_input.shape[0]
    in_pad = p["w1"].shape[0]
    out_pad = p["w4"].shape[1]
    out_dim = img_shape[0] * img_shape[1] * img_shape[2]

    # Pad batch (sublane / MXU M dim) to a multiple of 16 for packed bf16 vregs,
    # and lane-pad the feature dim; padded lanes are zero and multiply
    # zero-padded weight rows, padded rows are masked inside the kernel.
    b_pad = _round_up(batch, SUBLANE_BF16)
    x = _pad2(gen_input, b_pad, in_pad).astype(jnp.bfloat16)

    kernel_args = (
        x,
        p["w1"], p["v1"],
        p["w2"], p["v2"],
        p["w3"], p["v3"],
        p["w4"], p["b4"],
    )

    # ---- Footprint-based VMEM request -------------------------------------
    widest = max(p["w1"].shape[1], p["w2"].shape[1], p["w3"].shape[1], out_pad)
    arg_bytes = sum(int(a.size) * a.dtype.itemsize for a in kernel_args)
    out_bytes = b_pad * out_pad * 2                      # bf16 output
    # h, d, d*d temp + bf16 copy for the widest layer, all f32-sized for slack.
    interm_bytes = 4 * b_pad * widest * 4
    footprint = arg_bytes + out_bytes + interm_bytes + (4 << 20)   # headroom
    try:
        info = pltpu.get_tpu_info()
        phys_vmem = int(getattr(info, "vmem_capacity_bytes", 0)) or (64 << 20)
    except Exception:
        phys_vmem = 64 << 20                              # safe for v7x
    vmem_bytes = int(max(min(footprint, phys_vmem - (8 << 20)), 8 << 20))
    # TODO(synk): if `footprint` ever exceeds the per-core capacity, switch to a
    # batch/N-tiled grid (two-pass BN) instead of clamping.

    vmem_spec = pl.BlockSpec(memory_space=pltpu.MemorySpace.VMEM)
    flat = pl.pallas_call(
        functools.partial(_generator_kernel, real_batch=batch),
        out_shape=jax.ShapeDtypeStruct((b_pad, out_pad), jnp.bfloat16),
        in_specs=[vmem_spec] * len(kernel_args),
        out_specs=vmem_spec,
        compiler_params=pltpu.CompilerParams(vmem_limit_bytes=vmem_bytes),
    )(*kernel_args)

    # Drop padding (no-op when already aligned), then view(-1, *img_shape).
    if b_pad == batch and out_pad == out_dim:
        return flat.reshape((-1,) + tuple(img_shape))
    return flat[:batch, :out_dim].reshape((-1,) + tuple(img_shape))


# -----------------------------------------------------------------------------
# Parameters
# -----------------------------------------------------------------------------
def init_params(key, latent_dim, hidden_dim, nb_classes, embedding_dim,
                out_dim):
    """Unpadded f32 parameters matching the torch module
    (Linear weights stored pre-transposed as (in, out))."""
    ks = jax.random.split(key, 6)

    def lin(k, fan_in, fan_out):
        bound = 1.0 / jnp.sqrt(fan_in)
        kw, kb = jax.random.split(k)
        w = jax.random.uniform(kw, (fan_in, fan_out), jnp.float32,
                               -bound, bound)
        b = jax.random.uniform(kb, (1, fan_out), jnp.float32, -bound, bound)
        return w, b

    w1, b1 = lin(ks[0], latent_dim + embedding_dim, hidden_dim)
    w2, b2 = lin(ks[1], hidden_dim, hidden_dim * 2)
    w3, b3 = lin(ks[2], hidden_dim * 2, hidden_dim * 4)
    w4, b4 = lin(ks[3], hidden_dim * 4, out_dim)

    emb = jax.random.normal(ks[4], (nb_classes, embedding_dim), jnp.float32)

    return dict(
        emb=emb,
        w1=w1, b1=b1,
        g1=jnp.ones((1, hidden_dim), jnp.float32),
        be1=jnp.zeros((1, hidden_dim), jnp.float32),
        w2=w2, b2=b2,
        g2=jnp.ones((1, hidden_dim * 2), jnp.float32),
        be2=jnp.zeros((1, hidden_dim * 2), jnp.float32),
        w3=w3, b3=b3,
        g3=jnp.ones((1, hidden_dim * 4), jnp.float32),
        be3=jnp.zeros((1, hidden_dim * 4), jnp.float32),
        w4=w4, b4=b4,
    )


def prepare_params(params):
    """Zero-pad feature dims to multiples of 128 lanes; weights -> bf16.
    Per-layer (bias, gamma, beta) packed into one (3, N_pad) f32 array."""
    def pad_w(w):
        r = _round_up(w.shape[0], LANE)
        c = _round_up(w.shape[1], LANE)
        return _pad2(w, r, c).astype(jnp.bfloat16)

    def pad_v(v):
        return _pad2(v, 1, _round_up(v.shape[1], LANE))

    out = dict(emb=params["emb"])
    for i in (1, 2, 3):
        out[f"w{i}"] = pad_w(params[f"w{i}"])
        out[f"v{i}"] = jnp.concatenate(
            [pad_v(params[f"b{i}"]),
             pad_v(params[f"g{i}"]),
             pad_v(params[f"be{i}"])], axis=0)            # (3, N_pad) f32
    out["w4"] = pad_w(params["w4"])
    out["b4"] = pad_v(params["b4"])
    return out


# -----------------------------------------------------------------------------
# Reference (pure JAX, mirrors the kernel's mixed precision)
# -----------------------------------------------------------------------------
def reference_forward(z, labels, params, img_shape):
    emb = params["emb"][labels]
    x = jnp.concatenate([z, emb], axis=-1).astype(jnp.bfloat16)
    inv_b = 1.0 / x.shape[0]

    def block(x_bf, w, b, g, be):
        h = jnp.dot(x_bf, w.astype(jnp.bfloat16),
                    preferred_element_type=jnp.float32) + b
        h = jnp.maximum(h, NEG_SLOPE * h)
        mean = jnp.sum(h, axis=0, keepdims=True) * inv_b
        d = h - mean
        var = jnp.sum(d * d, axis=0, keepdims=True) * inv_b
        scale = g * jax.lax.rsqrt(var + EPS)
        return (d * scale + be).astype(jnp.bfloat16)

    h = block(x, params["w1"], params["b1"], params["g1"], params["be1"])
    h = block(h, params["w2"], params["b2"], params["g2"], params["be2"])
    h = block(h, params["w3"], params["b3"], params["g3"], params["be3"])
    y = jnp.tanh(jnp.dot(h, params["w4"].astype(jnp.bfloat16),
                         preferred_element_type=jnp.float32) + params["b4"])
    return y.astype(jnp.bfloat16).reshape((-1,) + tuple(img_shape))


# -----------------------------------------------------------------------------
if __name__ == "__main__":
    batch = 8
    latent_dim = 16
    hidden_dim = 32
    nb_classes = 10
    embedding_dim = 8
    img_shape = (1, 8, 8)                     # (C, H, W) -> flat 64
    out_dim = img_shape[0] * img_shape[1] * img_shape[2]

    key = jax.random.PRNGKey(0)
    k_params, k_z, k_lbl = jax.random.split(key, 3)

    params = init_params(k_params, latent_dim, hidden_dim, nb_classes,
                         embedding_dim, out_dim)
    padded_params = prepare_params(params)

    z = jax.random.normal(k_z, (batch, latent_dim), jnp.float32)
    labels = jax.random.randint(k_lbl, (batch,), 0, nb_classes, jnp.int32)

    fwd = jax.jit(functools.partial(generator_forward, img_shape=img_shape))
    out = fwd(z, labels, padded_params)
    out = jax.block_until_ready(out)

    ref = reference_forward(z, labels, params, img_shape)
    assert out.shape == (batch,) + img_shape
    assert jnp.allclose(out.astype(jnp.float32), ref.astype(jnp.float32),
                        atol=2e-2, rtol=2e-2), "mismatch vs reference"

    print("KERNEL_OK")
</pallas_src>

<mosaic_0001>
module attributes {stable_mosaic.version = 11 : i64} {
  func.func @_generator_kernel(%arg0: memref<16x128xbf16, #tpu.memory_space<vmem>>, %arg1: memref<128x128xbf16, #tpu.memory_space<vmem>>, %arg2: memref<3x128xf32, #tpu.memory_space<vmem>>, %arg3: memref<128x128xbf16, #tpu.memory_space<vmem>>, %arg4: memref<3x128xf32, #tpu.memory_space<vmem>>, %arg5: memref<128x128xbf16, #tpu.memory_space<vmem>>, %arg6: memref<3x128xf32, #tpu.memory_space<vmem>>, %arg7: memref<128x128xbf16, #tpu.memory_space<vmem>>, %arg8: memref<1x128xf32, #tpu.memory_space<vmem>>, %arg9: memref<16x128xbf16, #tpu.memory_space<vmem>>) attributes {dimension_semantics = [], scalar_prefetch = 0 : i64, scratch_operands = 0 : i64, tpu.core_type = #tpu.core_type<tc>} {
    %0 = tpu.iota {dimensions = array<i32: 0>} : vector<16x1xi32>
    %c8_i32 = arith.constant 8 : i32
    %1 = vector.broadcast %c8_i32 : i32 to vector<16x1xi32>
    %2 = arith.cmpi slt, %0, %1 : vector<16x1xi32>
    %c0 = arith.constant 0 : index
    %c0_0 = arith.constant 0 : index
    %3 = vector.load %arg0[%c0, %c0_0] : memref<16x128xbf16, #tpu.memory_space<vmem>>, vector<16x128xbf16>
    %c0_1 = arith.constant 0 : index
    %c0_2 = arith.constant 0 : index
    %4 = vector.load %arg2[%c0_1, %c0_2] : memref<3x128xf32, #tpu.memory_space<vmem>>, vector<3x128xf32>
    %5 = vector.extract_strided_slice %4 {offsets = [0, 0], sizes = [1, 128], strides = [1, 1]} : vector<3x128xf32> to vector<1x128xf32>
    %6 = vector.extract_strided_slice %4 {offsets = [1, 0], sizes = [1, 128], strides = [1, 1]} : vector<3x128xf32> to vector<1x128xf32>
    %7 = vector.extract_strided_slice %4 {offsets = [2, 0], sizes = [1, 128], strides = [1, 1]} : vector<3x128xf32> to vector<1x128xf32>
    %c0_3 = arith.constant 0 : index
    %c0_4 = arith.constant 0 : index
    %8 = vector.load %arg1[%c0_3, %c0_4] : memref<128x128xbf16, #tpu.memory_space<vmem>>, vector<128x128xbf16>
    %cst = arith.constant dense<0.000000e+00> : vector<16x128xf32>
    %9 = tpu.matmul %3, %8, %cst {dimension_numbers = #tpu.dot_dimension_numbers<[1], [0], [0], [1], [0, 0, 1, 1], [], []>} : vector<16x128xbf16>, vector<128x128xbf16>, vector<16x128xf32> -> vector<16x128xf32>
    %10 = vector.broadcast %5 : vector<1x128xf32> to vector<16x128xf32>
    %11 = arith.addf %9, %10 : vector<16x128xf32>
    %cst_5 = arith.constant 0.000000e+00 : f32
    %12 = vector.shape_cast %2 : vector<16x1xi1> to vector<16x1xi1>
    %13 = vector.broadcast %12 : vector<16x1xi1> to vector<16x128xi1>
    %14 = vector.broadcast %cst_5 : f32 to vector<16x128xf32>
    %15 = arith.select %13, %11, %14 : vector<16x128xi1>, vector<16x128xf32>
    %cst_6 = arith.constant 2.000000e-01 : f32
    %16 = vector.broadcast %cst_6 : f32 to vector<16x128xf32>
    %17 = arith.mulf %16, %15 : vector<16x128xf32>
    %18 = arith.maximumf %15, %17 : vector<16x128xf32>
    %cst_7 = arith.constant dense<0.000000e+00> : vector<128xf32>
    %19 = vector.multi_reduction <add>, %18, %cst_7 [0] : vector<16x128xf32> to vector<128xf32>
    %20 = vector.shape_cast %19 : vector<128xf32> to vector<1x128xf32>
    %cst_8 = arith.constant 1.250000e-01 : f32
    %21 = vector.broadcast %cst_8 : f32 to vector<1x128xf32>
    %22 = arith.mulf %20, %21 : vector<1x128xf32>
    %23 = vector.broadcast %22 : vector<1x128xf32> to vector<16x128xf32>
    %24 = arith.subf %18, %23 : vector<16x128xf32>
    %cst_9 = arith.constant 0.000000e+00 : f32
    %25 = vector.shape_cast %2 : vector<16x1xi1> to vector<16x1xi1>
    %26 = vector.broadcast %25 : vector<16x1xi1> to vector<16x128xi1>
    %27 = vector.broadcast %cst_9 : f32 to vector<16x128xf32>
    %28 = arith.select %26, %24, %27 : vector<16x128xi1>, vector<16x128xf32>
    %29 = arith.mulf %28, %28 : vector<16x128xf32>
    %cst_10 = arith.constant dense<0.000000e+00> : vector<128xf32>
    %30 = vector.multi_reduction <add>, %29, %cst_10 [0] : vector<16x128xf32> to vector<128xf32>
    %31 = vector.shape_cast %30 : vector<128xf32> to vector<1x128xf32>
    %cst_11 = arith.constant 1.250000e-01 : f32
    %32 = vector.broadcast %cst_11 : f32 to vector<1x128xf32>
    %33 = arith.mulf %31, %32 : vector<1x128xf32>
    %cst_12 = arith.constant 9.99999974E-6 : f32
    %34 = vector.broadcast %cst_12 : f32 to vector<1x128xf32>
    %35 = arith.addf %33, %34 : vector<1x128xf32>
    %36 = math.rsqrt %35 : vector<1x128xf32>
    %37 = arith.mulf %6, %36 : vector<1x128xf32>
    %38 = vector.broadcast %37 : vector<1x128xf32> to vector<16x128xf32>
    %39 = arith.mulf %28, %38 : vector<16x128xf32>
    %40 = vector.broadcast %7 : vector<1x128xf32> to vector<16x128xf32>
    %41 = arith.addf %39, %40 : vector<16x128xf32>
    %42 = arith.truncf %41 : vector<16x128xf32> to vector<16x128xbf16>
    %c0_13 = arith.constant 0 : index
    %c0_14 = arith.constant 0 : index
    %43 = vector.load %arg4[%c0_13, %c0_14] : memref<3x128xf32, #tpu.memory_space<vmem>>, vector<3x128xf32>
    %44 = vector.extract_strided_slice %43 {offsets = [0, 0], sizes = [1, 128], strides = [1, 1]} : vector<3x128xf32> to vector<1x128xf32>
    %45 = vector.extract_strided_slice %43 {offsets = [1, 0], sizes = [1, 128], strides = [1, 1]} : vector<3x128xf32> to vector<1x128xf32>
    %46 = vector.extract_strided_slice %43 {offsets = [2, 0], sizes = [1, 128], strides = [1, 1]} : vector<3x128xf32> to vector<1x128xf32>
    %c0_15 = arith.constant 0 : index
    %c0_16 = arith.constant 0 : index
    %47 = vector.load %arg3[%c0_15, %c0_16] : memref<128x128xbf16, #tpu.memory_space<vmem>>, vector<128x128xbf16>
    %cst_17 = arith.constant dense<0.000000e+00> : vector<16x128xf32>
    %48 = tpu.matmul %42, %47, %cst_17 {dimension_numbers = #tpu.dot_dimension_numbers<[1], [0], [0], [1], [0, 0, 1, 1], [], []>} : vector<16x128xbf16>, vector<128x128xbf16>, vector<16x128xf32> -> vector<16x128xf32>
    %49 = vector.broadcast %44 : vector<1x128xf32> to vector<16x128xf32>
    %50 = arith.addf %48, %49 : vector<16x128xf32>
    %cst_18 = arith.constant 0.000000e+00 : f32
    %51 = vector.shape_cast %2 : vector<16x1xi1> to vector<16x1xi1>
    %52 = vector.broadcast %51 : vector<16x1xi1> to vector<16x128xi1>
    %53 = vector.broadcast %cst_18 : f32 to vector<16x128xf32>
    %54 = arith.select %52, %50, %53 : vector<16x128xi1>, vector<16x128xf32>
    %cst_19 = arith.constant 2.000000e-01 : f32
    %55 = vector.broadcast %cst_19 : f32 to vector<16x128xf32>
    %56 = arith.mulf %55, %54 : vector<16x128xf32>
    %57 = arith.maximumf %54, %56 : vector<16x128xf32>
    %cst_20 = arith.constant dense<0.000000e+00> : vector<128xf32>
    %58 = vector.multi_reduction <add>, %57, %cst_20 [0] : vector<16x128xf32> to vector<128xf32>
    %59 = vector.shape_cast %58 : vector<128xf32> to vector<1x128xf32>
    %cst_21 = arith.constant 1.250000e-01 : f32
    %60 = vector.broadcast %cst_21 : f32 to vector<1x128xf32>
    %61 = arith.mulf %59, %60 : vector<1x128xf32>
    %62 = vector.broadcast %61 : vector<1x128xf32> to vector<16x128xf32>
    %63 = arith.subf %57, %62 : vector<16x128xf32>
    %cst_22 = arith.constant 0.000000e+00 : f32
    %64 = vector.shape_cast %2 : vector<16x1xi1> to vector<16x1xi1>
    %65 = vector.broadcast %64 : vector<16x1xi1> to vector<16x128xi1>
    %66 = vector.broadcast %cst_22 : f32 to vector<16x128xf32>
    %67 = arith.select %65, %63, %66 : vector<16x128xi1>, vector<16x128xf32>
    %68 = arith.mulf %67, %67 : vector<16x128xf32>
    %cst_23 = arith.constant dense<0.000000e+00> : vector<128xf32>
    %69 = vector.multi_reduction <add>, %68, %cst_23 [0] : vector<16x128xf32> to vector<128xf32>
    %70 = vector.shape_cast %69 : vector<128xf32> to vector<1x128xf32>
    %cst_24 = arith.constant 1.250000e-01 : f32
    %71 = vector.broadcast %cst_24 : f32 to vector<1x128xf32>
    %72 = arith.mulf %70, %71 : vector<1x128xf32>
    %cst_25 = arith.constant 9.99999974E-6 : f32
    %73 = vector.broadcast %cst_25 : f32 to vector<1x128xf32>
    %74 = arith.addf %72, %73 : vector<1x128xf32>
    %75 = math.rsqrt %74 : vector<1x128xf32>
    %76 = arith.mulf %45, %75 : vector<1x128xf32>
    %77 = vector.broadcast %76 : vector<1x128xf32> to vector<16x128xf32>
    %78 = arith.mulf %67, %77 : vector<16x128xf32>
    %79 = vector.broadcast %46 : vector<1x128xf32> to vector<16x128xf32>
    %80 = arith.addf %78, %79 : vector<16x128xf32>
    %81 = arith.truncf %80 : vector<16x128xf32> to vector<16x128xbf16>
    %c0_26 = arith.constant 0 : index
    %c0_27 = arith.constant 0 : index
    %82 = vector.load %arg6[%c0_26, %c0_27] : memref<3x128xf32, #tpu.memory_space<vmem>>, vector<3x128xf32>
    %83 = vector.extract_strided_slice %82 {offsets = [0, 0], sizes = [1, 128], strides = [1, 1]} : vector<3x128xf32> to vector<1x128xf32>
    %84 = vector.extract_strided_slice %82 {offsets = [1, 0], sizes = [1, 128], strides = [1, 1]} : vector<3x128xf32> to vector<1x128xf32>
    %85 = vector.extract_strided_slice %82 {offsets = [2, 0], sizes = [1, 128], strides = [1, 1]} : vector<3x128xf32> to vector<1x128xf32>
    %c0_28 = arith.constant 0 : index
    %c0_29 = arith.constant 0 : index
    %86 = vector.load %arg5[%c0_28, %c0_29] : memref<128x128xbf16, #tpu.memory_space<vmem>>, vector<128x128xbf16>
    %cst_30 = arith.constant dense<0.000000e+00> : vector<16x128xf32>
    %87 = tpu.matmul %81, %86, %cst_30 {dimension_numbers = #tpu.dot_dimension_numbers<[1], [0], [0], [1], [0, 0, 1, 1], [], []>} : vector<16x128xbf16>, vector<128x128xbf16>, vector<16x128xf32> -> vector<16x128xf32>
    %88 = vector.broadcast %83 : vector<1x128xf32> to vector<16x128xf32>
    %89 = arith.addf %87, %88 : vector<16x128xf32>
    %cst_31 = arith.constant 0.000000e+00 : f32
    %90 = vector.shape_cast %2 : vector<16x1xi1> to vector<16x1xi1>
    %91 = vector.broadcast %90 : vector<16x1xi1> to vector<16x128xi1>
    %92 = vector.broadcast %cst_31 : f32 to vector<16x128xf32>
    %93 = arith.select %91, %89, %92 : vector<16x128xi1>, vector<16x128xf32>
    %cst_32 = arith.constant 2.000000e-01 : f32
    %94 = vector.broadcast %cst_32 : f32 to vector<16x128xf32>
    %95 = arith.mulf %94, %93 : vector<16x128xf32>
    %96 = arith.maximumf %93, %95 : vector<16x128xf32>
    %cst_33 = arith.constant dense<0.000000e+00> : vector<128xf32>
    %97 = vector.multi_reduction <add>, %96, %cst_33 [0] : vector<16x128xf32> to vector<128xf32>
    %98 = vector.shape_cast %97 : vector<128xf32> to vector<1x128xf32>
    %cst_34 = arith.constant 1.250000e-01 : f32
    %99 = vector.broadcast %cst_34 : f32 to vector<1x128xf32>
    %100 = arith.mulf %98, %99 : vector<1x128xf32>
    %101 = vector.broadcast %100 : vector<1x128xf32> to vector<16x128xf32>
    %102 = arith.subf %96, %101 : vector<16x128xf32>
    %cst_35 = arith.constant 0.000000e+00 : f32
    %103 = vector.shape_cast %2 : vector<16x1xi1> to vector<16x1xi1>
    %104 = vector.broadcast %103 : vector<16x1xi1> to vector<16x128xi1>
    %105 = vector.broadcast %cst_35 : f32 to vector<16x128xf32>
    %106 = arith.select %104, %102, %105 : vector<16x128xi1>, vector<16x128xf32>
    %107 = arith.mulf %106, %106 : vector<16x128xf32>
    %cst_36 = arith.constant dense<0.000000e+00> : vector<128xf32>
    %108 = vector.multi_reduction <add>, %107, %cst_36 [0] : vector<16x128xf32> to vector<128xf32>
    %109 = vector.shape_cast %108 : vector<128xf32> to vector<1x128xf32>
    %cst_37 = arith.constant 1.250000e-01 : f32
    %110 = vector.broadcast %cst_37 : f32 to vector<1x128xf32>
    %111 = arith.mulf %109, %110 : vector<1x128xf32>
    %cst_38 = arith.constant 9.99999974E-6 : f32
    %112 = vector.broadcast %cst_38 : f32 to vector<1x128xf32>
    %113 = arith.addf %111, %112 : vector<1x128xf32>
    %114 = math.rsqrt %113 : vector<1x128xf32>
    %115 = arith.mulf %84, %114 : vector<1x128xf32>
    %116 = vector.broadcast %115 : vector<1x128xf32> to vector<16x128xf32>
    %117 = arith.mulf %106, %116 : vector<16x128xf32>
    %118 = vector.broadcast %85 : vector<1x128xf32> to vector<16x128xf32>
    %119 = arith.addf %117, %118 : vector<16x128xf32>
    %120 = arith.truncf %119 : vector<16x128xf32> to vector<16x128xbf16>
    %c0_39 = arith.constant 0 : index
    %c0_40 = arith.constant 0 : index
    %121 = vector.load %arg7[%c0_39, %c0_40] : memref<128x128xbf16, #tpu.memory_space<vmem>>, vector<128x128xbf16>
    %cst_41 = arith.constant dense<0.000000e+00> : vector<16x128xf32>
    %122 = tpu.matmul %120, %121, %cst_41 {dimension_numbers = #tpu.dot_dimension_numbers<[1], [0], [0], [1], [0, 0, 1, 1], [], []>} : vector<16x128xbf16>, vector<128x128xbf16>, vector<16x128xf32> -> vector<16x128xf32>
    %c0_42 = arith.constant 0 : index
    %c0_43 = arith.constant 0 : index
    %123 = vector.load %arg8[%c0_42, %c0_43] : memref<1x128xf32, #tpu.memory_space<vmem>>, vector<1x128xf32>
    %124 = vector.broadcast %123 : vector<1x128xf32> to vector<16x128xf32>
    %125 = arith.addf %122, %124 : vector<16x128xf32>
    %126 = math.tanh %125 : vector<16x128xf32>
    %127 = arith.truncf %126 : vector<16x128xf32> to vector<16x128xbf16>
    %c0_44 = arith.constant 0 : index
    %c0_45 = arith.constant 0 : index
    %128 = vector.load %arg9[%c0_44, %c0_45] : memref<16x128xbf16, #tpu.memory_space<vmem>>, vector<16x128xbf16>
    tpu.vector_store %arg9[%c0_44, %c0_45], %127 {strides = array<i32>} : memref<16x128xbf16, #tpu.memory_space<vmem>>, vector<16x128xbf16>,
    return
  }
}

</mosaic_0001>

<bundles_post_ra>
// kernel: generator_forward.1
= control target key start
LH: loop header
LB: loop body
LE: loop exit
PB: predicated region body
PF: predicated region fallthrough
CT: control target
= control target key end

     0   :  { %14 = vsyncpa [#allocation3], 0  ;;  %s939_s0 = inlined_call_operand.vmem [shape: bf16[16,128], index: 0, kind: input, shape index: {}]   ;;  %s940_s1 = inlined_call_operand.vmem [shape: bf16[128,128], index: 1, kind: input, shape index: {}]   ;;  %s941_s2 = inlined_call_operand.vmem [shape: f32[3,128], index: 2, kind: input, shape index: {}]   ;;  %s942_s3 = inlined_call_operand.hbm [shape: bf16[128,128], index: 3, kind: input, shape index: {}]   ;;  %s943_s4 = inlined_call_operand.vmem [shape: f32[3,128], index: 4, kind: input, shape index: {}]   ;;  %s944_s5 = inlined_call_operand.hbm [shape: bf16[128,128], index: 5, kind: input, shape index: {}]   ;;  %s945_s6 = inlined_call_operand.vmem [shape: f32[3,128], index: 6, kind: input, shape index: {}]   ;;  %s946_s7 = inlined_call_operand.hbm [shape: bf16[128,128], index: 7, kind: input, shape index: {}]   ;;  %s947_s8 = inlined_call_operand.vmem [shape: f32[1,128], index: 8, kind: input, shape index: {}]   ;;  %s948_s9 = inlined_call_operand.vmem [shape: bf16[16,128], index: 9, kind: output, shape index: {}]  }
   0x1   :  { %15 = vsyncpa [#allocation5], 0  ;;  %s41_s11 = sshll.u32 %s944_s5, 4  ;;  %s833_s12 = smov [#allocation4]   ;;  %s42_s11 = int_to_ptr.hbm [resolvable:$true] %s41_s11 }
   0x2   :  { %s43_s13 = sshll.u32 %s833_s12, 4  ;;  %s26_s16 = sshll.u32 %s942_s3, 4  ;;  %s44_s13 = int_to_ptr.vmem [resolvable:$true] %s43_s13  ;;  %s27_s16 = int_to_ptr.hbm [resolvable:$true] %s26_s16 }
   0x3   :  { %s834_s17 = smov 64   ;;  %s835_s18 = smov 4  }
   0x4   :  { %49 = dma.hbm_to_vmem [thread:$0]  %s42_s11, 1024, %s44_s13, [#allocation5], %s834_s17, %s834_s17, %s835_s18  }
   0x5   :  { %s836_s19 = smov [#allocation2]   ;;  %s56_s23 = sshll.u32 %s946_s7, 4  ;;  %s57_s23 = int_to_ptr.hbm [resolvable:$true] %s56_s23 }
   0x6   :  { %s28_s20 = sshll.u32 %s836_s19, 4  ;;  %s837_s5 = smov [#allocation6]   ;;  %s29_s20 = int_to_ptr.vmem [resolvable:$true] %s28_s20 }
   0x7   :  { %34 = dma.hbm_to_vmem [thread:$0]  %s27_s16, 1024, %s29_s20, [#allocation3], %s834_s17, %s834_s17, %s835_s18  }
   0x8   :  { %s58_s24 = sshll.u32 %s837_s5, 4  ;;  %s59_s24 = int_to_ptr.vmem [resolvable:$true] %s58_s24 }
   0x9   :  { %64 = dma.hbm_to_vmem [thread:$0]  %s57_s23, 1024, %s59_s24, [#allocation5], %s834_s17, %s834_s17, %s835_s18  }
   0xa   :  { %829 = dma.done.wait [#allocation3], 1024  }
   0xb   :  { %830 = vsyncadd [#allocation3], 4294966272 }
   0xc   :  { %831 = dma.done.wait [#allocation5], 2048  }
   0xd   :  { %832 = vsyncadd [#allocation5], 4294965248  ;;  %v711_v0 = vld [vmem:[%s940_s1 + $0x38] sm:$0xff]  ;;  %v710_v1 = vld [vmem:[%s940_s1 + $0x30] sm:$0xff] }
   0xe   :  { %158 = vmatpush.bf16.msra.mxu0 %v711_v0  ;;  %v709_v2 = vld [vmem:[%s940_s1 + $0x28] sm:$0xff]  ;;  %v708_v3 = vld [vmem:[%s940_s1 + $0x20] sm:$0xff]  ;;  %v707_v4 = vld [vmem:[%s940_s1 + $0x18] sm:$0xff] }
   0xf   :  { %v706_v5 = vld [vmem:[%s940_s1 + $0x10] sm:$0xff]  ;;  %v705_v6 = vld [vmem:[%s940_s1 + $0x8] sm:$0xff]  ;;  %v704_v7 = vld [vmem:[%s940_s1] sm:$0xff] }
  0x10   :  { %v703_v8 = vld [vmem:[%s939_s0] sm:$0xff]  ;;  %v719_v14 = vld [vmem:[#allocation2 + $0x38] sm:$0xff]  ;;  %v718_v18 = vld [vmem:[#allocation2 + $0x30] sm:$0xff] }
  0x11   :  { %v86_v9 = vld [vmem:[%s941_s2] sm:$0x7]  ;;  %289 = vmatpush.bf16.msra.mxu1 %v719_v14  ;;  %v717_v21 = vld [vmem:[#allocation2 + $0x28] sm:$0xff]  ;;  %v715_v27 = vld [vmem:[#allocation2 + $0x18] sm:$0xff] }
  0x12   :  { %159 = vmatpush.bf16.msra.mxu0 %v710_v1  ;;  %v103_v10 = vperm.slane %v86_v9, 0  ;;  %v716_v24 = vld [vmem:[#allocation2 + $0x20] sm:$0xff]  ;;  %v714_v30 = vld [vmem:[#allocation2 + $0x10] sm:$0xff]  ;;  %v713_v33 = vld [vmem:[#allocation2 + $0x8] sm:$0xff]  ;;  %v219_v50 = vperm.slane %v86_v9, 2 }
  0x13   :  { %v712_v35 = vld [vmem:[#allocation2] sm:$0xff]  ;;  %v727_v61 = vld [vmem:[#allocation4 + $0x38] sm:$0xff]  ;;  %v726_v1 = vld [vmem:[#allocation4 + $0x30] sm:$0xff] }
  0x14   :  { %v223_v56 = vld [vmem:[%s943_s4] sm:$0x7]  ;;  %416 = vmatpush.bf16.msra.mxu2 %v727_v61 }
  0x15   :  { %290 = vmatpush.bf16.msra.mxu1 %v718_v18  ;;  %v240_v57 = vperm.slane %v223_v56, 0  ;;  %v720_v18 = vld [vmem:[#allocation4] sm:$0xff] }
  0x16   :  { %160 = vmatpush.bf16.msra.mxu0 %v709_v2 }
  0x18   :  { %417 = vmatpush.bf16.msra.mxu2 %v726_v1  ;;  %v728_v1 = vld [vmem:[#allocation6] sm:$0xff] }
  0x19   :  { %291 = vmatpush.bf16.msra.mxu1 %v717_v21 }
  0x1a   :  { %161 = vmatpush.bf16.msra.mxu0 %v708_v3 }
  0x1d   :  { %292 = vmatpush.bf16.msra.mxu1 %v716_v24 }
  0x1e   :  { %162 = vmatpush.bf16.msra.mxu0 %v707_v4  ;;  %v725_v4 = vld [vmem:[#allocation4 + $0x28] sm:$0xff] }
  0x1f   :  { %418 = vmatpush.bf16.msra.mxu2 %v725_v4 }
  0x21   :  { %293 = vmatpush.bf16.msra.mxu1 %v715_v27 }
  0x22   :  { %163 = vmatpush.bf16.msra.mxu0 %v706_v5 }
  0x25   :  { %294 = vmatpush.bf16.msra.mxu1 %v714_v30 }
  0x26   :  { %164 = vmatpush.bf16.msra.mxu0 %v705_v6 }
  0x29   :  { %295 = vmatpush.bf16.msra.mxu1 %v713_v33  ;;  %v346_v33 = vperm.slane %v223_v56, 2 }
  0x2a   :  { %165 = vmatpush.bf16.msra.mxu0 %v704_v7  ;;  %v724_v7 = vld [vmem:[#allocation4 + $0x20] sm:$0xff] }
  0x2b   :  { %419 = vmatpush.bf16.msra.mxu2 %v724_v7 }
  0x2d   :  { %166 = vmatmul.bf16.vlgmr.msra.gmra.mxu0 %v703_v8  ;;  %296 = vmatpush.bf16.msra.mxu1 %v712_v35 }
  0xaa   :  { %v167_v11 = vpop.f32.mrf.mxu0 }
  0xab   :  { %v168_v12 = vadd.f32 %v167_v11, %v103_v10  ;;  %v723_v10 = vld [vmem:[#allocation4 + $0x18] sm:$0xff] }
  0xac   :  { %420 = vmatpush.bf16.msra.mxu2 %v723_v10 }
  0xad   :  { %v178_v13 = vmul.f32 0.2, %v168_v12 }
  0xaf   :  { %v180_v15 = vmax.f32 %v168_v12, %v178_v13  ;;  %v722_v13 = vld [vmem:[#allocation4 + $0x10] sm:$0xff] }
  0xb0   :  { %421 = vmatpush.bf16.msra.mxu2 %v722_v13 }
  0xb1   :  { %v183_v16 = vrot.slane %v180_v15, 4 }
  0xb2   :  { %v169_v17 = vpop.f32.mrf.mxu0 }
  0xb3   :  { %v184_v19 = vadd.f32 %v183_v16, %v180_v15  ;;  %v721_v16 = vld [vmem:[#allocation4 + $0x8] sm:$0xff] }
  0xb4   :  { %422 = vmatpush.bf16.msra.mxu2 %v721_v16 }
  0xb5   :  { %v185_v20 = vrot.slane %v184_v19, 2 }
  0xb7   :  { %v186_v22 = vadd.f32 %v185_v20, %v184_v19 }
  0xb8   :  { %423 = vmatpush.bf16.msra.mxu2 %v720_v18 }
  0xb9   :  { %v187_v23 = vrot.slane %v186_v22, 1 }
  0xbb   :  { %v188_v25 = vadd.f32 %v187_v23, %v186_v22 }
  0xbd   :  { %v189_v26 = vmul.f32 0.125, %v188_v25 }
  0xbf   :  { %v190_v28 = vsub.f32 %v180_v15, %v189_v26 }
  0xc1   :  { %v194_v29 = vmul.f32 %v190_v28, %v190_v28 }
  0xc3   :  { %v197_v31 = vrot.slane %v194_v29, 4 }
  0xc5   :  { %v198_v32 = vadd.f32 %v197_v31, %v194_v29 }
  0xc7   :  { %v199_v34 = vrot.slane %v198_v32, 2 }
  0xc9   :  { %v200_v36 = vadd.f32 %v199_v34, %v198_v32 }
  0xcb   :  { %v201_v37 = vrot.slane %v200_v36, 1 }
  0xcd   :  { %v202_v38 = vadd.f32 %v201_v37, %v200_v36 }
  0xcf   :  { %v203_v39 = vmul.f32 0.125, %v202_v38 }
  0xd1   :  { %v204_v40 = vadd.f32 1e-05, %v203_v39  ;;  %v350_v39 = vld [vmem:[%s945_s6] sm:$0x7] }
  0xd2   :  { %v473_v16 = vperm.slane %v350_v39, 2 }
  0xd3   :  { %747 = vrsqrt.f32 %v204_v40  ;;  %vm211_vm1 = vweird.f32 %v204_v40 }
  0xd9   :  { %v748_v41 = vpop.eup %747 }
  0xda   :  { %v206_v42 = vmul.f32 %v748_v41, %v204_v40  ;;  %vm212_vm0 = vweird.f32 %v748_v41  ;;  %v367_v40 = vperm.slane %v350_v39, 0 }
  0xdb   :  { %vm213_vm2 = vmor %vm211_vm1, %vm212_vm0 }
  0xdc   :  { %v207_v43 = vmul.f32 %v748_v41, %v206_v42 }
  0xde   :  { %v208_v44 = vmul.f32 0.5, %v207_v43 }
  0xe0   :  { %v209_v45 = vsub.f32 1.5, %v208_v44  ;;  %v735_v44 = vld [vmem:[#allocation6 + $0x38] sm:$0xff] }
  0xe1   :  { %545 = vmatpush.bf16.msra.mxu3 %v735_v44 }
  0xe2   :  { %v210_v46 = vmul.f32 %v748_v41, %v209_v45 }
  0xe4   :  { %v214_v47 = vsel %vm213_vm2, %v748_v41, %v210_v46 }
  0xe5   :  { %v215_v48 = vmul.f32 %v214_v47, %v86_v9 }
  0xe7   :  { %v216_v49 = vperm.slane %v215_v48, 1  ;;  %v734_v48 = vld [vmem:[#allocation6 + $0x30] sm:$0xff] }
  0xe8   :  { %546 = vmatpush.bf16.msra.mxu3 %v734_v48 }
  0xe9   :  { %v217_v51 = vmul.f32 %v216_v49, %v190_v28  ;;  %v218_v52 = vmul.f32 0.0, %v216_v49 }
  0xeb   :  { %v220_v53 = vadd.f32 %v219_v50, %v217_v51  ;;  %v221_v54 = vadd.f32 %v219_v50, %v218_v52  ;;  %v733_v51 = vld [vmem:[#allocation6 + $0x28] sm:$0xff] }
  0xec   :  { %547 = vmatpush.bf16.msra.mxu3 %v733_v51 }
  0xed   :  { %v222_v55 = vpack.c.bf16 %v221_v54, %v220_v53  ;;  %v732_v54 = vld [vmem:[#allocation6 + $0x20] sm:$0xff] }
  0xef   :  { %297 = vmatmul.bf16.vlgmr.msra.gmra.mxu1 %v222_v55 }
  0xf0   :  { %548 = vmatpush.bf16.msra.mxu3 %v732_v54 }
 0x16c   :  { %v298_v58 = vpop.f32.mrf.mxu1 }
 0x16d   :  { %v299_v59 = vadd.f32 %v298_v58, %v240_v57  ;;  %v731_v57 = vld [vmem:[#allocation6 + $0x18] sm:$0xff] }
 0x16e   :  { %549 = vmatpush.bf16.msra.mxu3 %v731_v57 }
 0x16f   :  { %v305_v60 = vmul.f32 0.2, %v299_v59 }
 0x171   :  { %v307_v62 = vmax.f32 %v299_v59, %v305_v60  ;;  %v730_v60 = vld [vmem:[#allocation6 + $0x10] sm:$0xff] }
 0x172   :  { %550 = vmatpush.bf16.msra.mxu3 %v730_v60 }
 0x173   :  { %v310_v63 = vrot.slane %v307_v62, 4 }
 0x174   :  { %v300_v0 = vpop.f32.mrf.mxu1 }
 0x175   :  { %v311_v2 = vadd.f32 %v310_v63, %v307_v62  ;;  %v729_v63 = vld [vmem:[#allocation6 + $0x8] sm:$0xff] }
 0x176   :  { %551 = vmatpush.bf16.msra.mxu3 %v729_v63 }
 0x177   :  { %v312_v3 = vrot.slane %v311_v2, 2 }
 0x179   :  { %v313_v5 = vadd.f32 %v312_v3, %v311_v2 }
 0x17a   :  { %552 = vmatpush.bf16.msra.mxu3 %v728_v1 }
 0x17b   :  { %v314_v6 = vrot.slane %v313_v5, 1 }
 0x17d   :  { %v315_v8 = vadd.f32 %v314_v6, %v313_v5 }
 0x17f   :  { %v316_v9 = vmul.f32 0.125, %v315_v8 }
 0x181   :  { %v317_v11 = vsub.f32 %v307_v62, %v316_v9 }
 0x183   :  { %v321_v12 = vmul.f32 %v317_v11, %v317_v11 }
 0x185   :  { %v324_v14 = vrot.slane %v321_v12, 4 }
 0x187   :  { %v325_v15 = vadd.f32 %v324_v14, %v321_v12 }
 0x189   :  { %v326_v17 = vrot.slane %v325_v15, 2 }
 0x18b   :  { %v327_v19 = vadd.f32 %v326_v17, %v325_v15 }
 0x18d   :  { %v328_v20 = vrot.slane %v327_v19, 1 }
 0x18f   :  { %v329_v21 = vadd.f32 %v328_v20, %v327_v19 }
 0x191   :  { %v330_v22 = vmul.f32 0.125, %v329_v21 }
 0x193   :  { %v331_v23 = vadd.f32 1e-05, %v330_v22 }
 0x195   :  { %749 = vrsqrt.f32 %v331_v23  ;;  %vm338_vm4 = vweird.f32 %v331_v23 }
 0x19b   :  { %v750_v24 = vpop.eup %749 }
 0x19c   :  { %v333_v25 = vmul.f32 %v750_v24, %v331_v23  ;;  %vm339_vm3 = vweird.f32 %v750_v24  ;;  %v746_v23 = vld [vmem:[%s947_s8] ss:$0 sm:$0xff] }
 0x19d   :  { %vm340_vm5 = vmor %vm338_vm4, %vm339_vm3 }
 0x19e   :  { %v334_v26 = vmul.f32 %v750_v24, %v333_v25 }
 0x1a0   :  { %v335_v27 = vmul.f32 0.5, %v334_v26 }
 0x1a2   :  { %v336_v28 = vsub.f32 1.5, %v335_v27 }
 0x1a4   :  { %v337_v29 = vmul.f32 %v750_v24, %v336_v28 }
 0x1a6   :  { %v341_v30 = vsel %vm340_vm5, %v750_v24, %v337_v29 }
 0x1a7   :  { %v342_v31 = vmul.f32 %v341_v30, %v223_v56 }
 0x1a9   :  { %v343_v32 = vperm.slane %v342_v31, 1 }
 0x1ab   :  { %v344_v34 = vmul.f32 %v343_v32, %v317_v11  ;;  %v345_v35 = vmul.f32 0.0, %v343_v32 }
 0x1ad   :  { %v347_v36 = vadd.f32 %v346_v33, %v344_v34  ;;  %v348_v37 = vadd.f32 %v346_v33, %v345_v35 }
 0x1af   :  { %v349_v38 = vpack.c.bf16 %v348_v37, %v347_v36 }
 0x1b1   :  { %424 = vmatmul.bf16.vlgmr.msra.gmra.mxu2 %v349_v38 }
 0x234   :  { %v425_v41 = vpop.f32.mrf.mxu2 }
 0x235   :  { %v426_v42 = vadd.f32 %v425_v41, %v367_v40 }
 0x237   :  { %v432_v43 = vmul.f32 0.2, %v426_v42 }
 0x239   :  { %v434_v45 = vmax.f32 %v426_v42, %v432_v43 }
 0x23b   :  { %v437_v46 = vrot.slane %v434_v45, 4 }
 0x23c   :  { %v427_v47 = vpop.f32.mrf.mxu2 }
 0x23d   :  { %v438_v49 = vadd.f32 %v437_v46, %v434_v45 }
 0x23f   :  { %v439_v50 = vrot.slane %v438_v49, 2 }
 0x241   :  { %v440_v52 = vadd.f32 %v439_v50, %v438_v49 }
 0x243   :  { %v441_v53 = vrot.slane %v440_v52, 1 }
 0x245   :  { %v442_v55 = vadd.f32 %v441_v53, %v440_v52 }
 0x247   :  { %v443_v56 = vmul.f32 0.125, %v442_v55 }
 0x249   :  { %v444_v58 = vsub.f32 %v434_v45, %v443_v56 }
 0x24b   :  { %v448_v59 = vmul.f32 %v444_v58, %v444_v58 }
 0x24d   :  { %v451_v61 = vrot.slane %v448_v59, 4 }
 0x24f   :  { %v452_v62 = vadd.f32 %v451_v61, %v448_v59 }
 0x251   :  { %v453_v0 = vrot.slane %v452_v62, 2 }
 0x253   :  { %v454_v2 = vadd.f32 %v453_v0, %v452_v62 }
 0x255   :  { %v455_v3 = vrot.slane %v454_v2, 1 }
 0x257   :  { %v456_v4 = vadd.f32 %v455_v3, %v454_v2 }
 0x259   :  { %v457_v5 = vmul.f32 0.125, %v456_v4 }
 0x25b   :  { %v458_v6 = vadd.f32 1e-05, %v457_v5 }
 0x25d   :  { %751 = vrsqrt.f32 %v458_v6  ;;  %vm465_vm7 = vweird.f32 %v458_v6 }
 0x263   :  { %v752_v7 = vpop.eup %751 }
 0x264   :  { %v460_v8 = vmul.f32 %v752_v7, %v458_v6  ;;  %vm466_vm6 = vweird.f32 %v752_v7 }
 0x265   :  { %vm467_vm8 = vmor %vm465_vm7, %vm466_vm6 }
 0x266   :  { %v461_v9 = vmul.f32 %v752_v7, %v460_v8 }
 0x268   :  { %v462_v10 = vmul.f32 0.5, %v461_v9 }
 0x26a   :  { %v463_v11 = vsub.f32 1.5, %v462_v10 }
 0x26c   :  { %v464_v12 = vmul.f32 %v752_v7, %v463_v11 }
 0x26e   :  { %v468_v13 = vsel %vm467_vm8, %v752_v7, %v464_v12 }
 0x26f   :  { %v469_v14 = vmul.f32 %v468_v13, %v350_v39 }
 0x271   :  { %v470_v15 = vperm.slane %v469_v14, 1 }
 0x273   :  { %v471_v17 = vmul.f32 %v470_v15, %v444_v58  ;;  %v472_v18 = vmul.f32 0.0, %v470_v15 }
 0x275   :  { %v474_v19 = vadd.f32 %v473_v16, %v471_v17  ;;  %v475_v20 = vadd.f32 %v473_v16, %v472_v18 }
 0x277   :  { %v476_v21 = vpack.c.bf16 %v475_v20, %v474_v19 }
 0x279   :  { %553 = vmatmul.bf16.vlgmr.msra.gmra.mxu3 %v476_v21 }
 0x2fc   :  { %v554_v22 = vpop.f32.mrf.mxu3 }
 0x2fd   :  { %v555_v24 = vadd.f32 %v746_v23, %v554_v22 }
 0x2ff   :  { %753 = vtanh.f32 %v555_v24 }
 0x304   :  { %v556_v25 = vpop.f32.mrf.mxu3 }
 0x305   :  { %v557_v26 = vadd.f32 %v746_v23, %v556_v25  ;;  %v754_v27 = vpop.eup %753 }
 0x307   :  { %755 = vtanh.f32 %v557_v26 }
 0x30d   :  { %v756_v28 = vpop.eup %755 }
 0x30e   :  { %v739_v29 = vpack.c.bf16 %v756_v28, %v754_v27 }
 0x310   :  { %740 = vst [vmem:[%s948_s9] sm:$0xff] %v739_v29  }
 0x311   :  { %569 = vsyncpa [#allocation3], 1 }
 0x312   :  { %570 = vsyncpa [#allocation5], 1 }

</bundles_post_ra>
